<compile_context>
chip_gen: v5e
topology: v5e:2x2
jax: 0.10.0
libtpu: 0.0.40
codegen_flags: <defaults>
</compile_context>

<pallas_src>
import functools

import jax
import jax.numpy as jnp
from jax.experimental import pallas as pl
from jax.experimental.pallas import tpu as pltpu

_SLAB_WIDTHS = (2048, 1024, 512, 256, 128)  # lane-dense candidates (mult. of 128)
_MAX_BLOCK_BYTES = 4 * 1024 * 1024          # ~4 MiB per block buffer
_TARGET_GRID_STEPS = 8                      # >=2 for v7x dual-TC, >=4-8 for pipelining
_VMEM_LIMIT_BYTES = 48 * 1024 * 1024        # 4 MiB blocks, in+out double-buffered,
                                            # + headroom; < v7x 64 MiB physical VMEM


def _round_up(x, m):
    return ((x + m - 1) // m) * m


def _choose_slab_width(n):
    """Largest lane-dense width that divides numel (None -> must pad)."""
    for w in _SLAB_WIDTHS:
        if n % w == 0:
            return w
    return None


def _bf16_alu_ok():
    """True on chips with a bf16 VALU (v6e/Trillium and newer)."""
    try:
        kind = jax.devices()[0].device_kind.lower()
    except Exception:
        return False
    return not any(s in kind for s in ("v2", "v3", "v4", "v5"))


def _tropical_kernel(pn_ref, pd_ref, cn_ref, cd_ref, x_ref, o_ref, *,
                     n_terms, compute_dtype):
    """Per-block tropical rational activation.

    For every element x:
        num = max_k (x * powers_num[k]   + coeff_num[k])
        den = max_k (x * powers_denom[k] + coeff_denom[k])
        out = num - den
    """
    x = x_ref[...]
    if x.dtype != compute_dtype:
        x = x.astype(compute_dtype)

    # Hoist all scalar parameter reads off the vector critical path.
    pn = [pn_ref[k] for k in range(n_terms)]
    pd = [pd_ref[k] for k in range(n_terms)]
    cn = [cn_ref[k] for k in range(n_terms)]
    cd = [cd_ref[k] for k in range(n_terms)]
    if compute_dtype != jnp.float32:
        # bf16 compute path (v6e/v7x only): keep the broadcasted arithmetic in
        # bf16 so packed [16,128] vregs do 2 elements per VALU op.
        pn = [p.astype(compute_dtype) for p in pn]
        pd = [p.astype(compute_dtype) for p in pd]
        cn = [c.astype(compute_dtype) for c in cn]
        cd = [c.astype(compute_dtype) for c in cd]

    num = x * pn[0] + cn[0]
    den = x * pd[0] + cd[0]
    # degree is tiny and static -> unrolled VPU max-chain (mul+add+max per term).
    for k in range(1, n_terms):
        num = jnp.maximum(num, x * pn[k] + cn[k])
        den = jnp.maximum(den, x * pd[k] + cd[k])
    o_ref[...] = (num - den).astype(o_ref.dtype)


def tropical_rational_activation(x, powers_num, powers_denom,
                                 coefficients_num, coefficients_denom):
    """Pallas-backed forward pass matching TropicalRationalActivation.forward."""
    orig_shape = x.shape
    orig_dtype = x.dtype
    n_terms = int(powers_num.shape[0])
    assert (int(powers_denom.shape[0]) == n_terms
            and int(coefficients_num.shape[0]) == n_terms
            and int(coefficients_denom.shape[0]) == n_terms), \
        "all parameter vectors must have length degree + 1"

    # Parameters live in SMEM as f32 scalars (asserted by casting here).
    powers_num = powers_num.astype(jnp.float32)
    powers_denom = powers_denom.astype(jnp.float32)
    coefficients_num = coefficients_num.astype(jnp.float32)
    coefficients_denom = coefficients_denom.astype(jnp.float32)

    flat = x.reshape(-1)
    n = flat.shape[0]
    itemsize = jnp.dtype(orig_dtype).itemsize

    # Pick the widest lane-dense slab that divides numel exactly -> no pad /
    # unpad HBM copies. Only if numel % 128 != 0 (rare for activations) do we
    # pad by < 128 elements (still one extra pass; unavoidable without ragged
    # tail handling).
    slab_w = _choose_slab_width(n)
    n_pad = 0
    if slab_w is None:
        slab_w = 128
        n_pad = (-n) % 128
        flat = jnp.pad(flat, (0, n_pad))
    x2 = flat.reshape(-1, slab_w)          # (rows, slab_w), lane-dense
    rows = x2.shape[0]

    # Compute dtype: bf16 chains only on chips with a bf16 VALU (v6e/v7x);
    # otherwise (f32 inputs or v5e) compute in f32 and cast at the store.
    if orig_dtype == jnp.bfloat16 and _bf16_alu_ok():
        compute_dtype = jnp.bfloat16
    else:
        compute_dtype = jnp.float32

    # Sublane alignment for the block's second-to-last dim (8 f32 / 16 bf16).
    row_align = max(8, 32 // itemsize)

    # Block rows: cap by ~4 MiB per buffer, but shrink so the grid has at
    # least ~_TARGET_GRID_STEPS steps (pipelining + v7x dual-TC sharding).
    max_block_rows = max(row_align,
                         (_MAX_BLOCK_BYTES // (slab_w * itemsize))
                         // row_align * row_align)
    want_rows = _round_up(pl.cdiv(rows, _TARGET_GRID_STEPS), row_align)
    block_rows = min(max_block_rows, want_rows)
    if block_rows >= rows:
        block_rows = rows                  # tiny tensor: single full-extent block
    grid = (pl.cdiv(rows, block_rows),)

    kernel = functools.partial(_tropical_kernel, n_terms=n_terms,
                               compute_dtype=compute_dtype)

    cost = pl.CostEstimate(
        flops=(6 * n_terms - 1) * n,
        transcendentals=0,
        bytes_accessed=2 * n * itemsize + 4 * n_terms * 4,
    )

    out2 = pl.pallas_call(
        kernel,
        out_shape=jax.ShapeDtypeStruct(x2.shape, orig_dtype),
        grid=grid,
        in_specs=[
            pl.BlockSpec(memory_space=pltpu.SMEM),   # powers_num
            pl.BlockSpec(memory_space=pltpu.SMEM),   # powers_denom
            pl.BlockSpec(memory_space=pltpu.SMEM),   # coefficients_num
            pl.BlockSpec(memory_space=pltpu.SMEM),   # coefficients_denom
            pl.BlockSpec((block_rows, slab_w), lambda i: (i, 0)),
        ],
        out_specs=pl.BlockSpec((block_rows, slab_w), lambda i: (i, 0)),
        compiler_params=pltpu.CompilerParams(
            dimension_semantics=("parallel",),
            vmem_limit_bytes=_VMEM_LIMIT_BYTES),
        cost_estimate=cost,
    )(powers_num, powers_denom, coefficients_num, coefficients_denom, x2)

    out_flat = out2.reshape(-1)
    if n_pad:
        out_flat = out_flat[:n]
    return out_flat.reshape(orig_shape)


def tropical_rational_activation_ref(x, pn, pd, cn, cd):
    """Pure-JAX reference (mirrors the PyTorch forward exactly)."""
    x_num = x[..., None] * pn
    x_denom = x[..., None] * pd
    return jnp.max(x_num + cn, axis=-1) - jnp.max(x_denom + cd, axis=-1)


if __name__ == "__main__":
    degree = 3  # powers / coefficients have shape (degree + 1,)

    key = jax.random.PRNGKey(0)
    k_x, k_pn, k_pd, k_cn, k_cd = jax.random.split(key, 5)

    # NCHW input, matching the PyTorch convention.
    x = jax.random.normal(k_x, (2, 4, 16, 16), dtype=jnp.float32)

    # Deterministic "randn" parameter init (same shapes as the nn.Parameters).
    powers_num = jax.random.normal(k_pn, (degree + 1,), dtype=jnp.float32)
    powers_denom = jax.random.normal(k_pd, (degree + 1,), dtype=jnp.float32)
    coefficients_num = jax.random.normal(k_cn, (degree + 1,), dtype=jnp.float32)
    coefficients_denom = jax.random.normal(k_cd, (degree + 1,), dtype=jnp.float32)

    out = tropical_rational_activation(
        x, powers_num, powers_denom, coefficients_num, coefficients_denom)
    out = jax.block_until_ready(out)

    ref = tropical_rational_activation_ref(
        x, powers_num, powers_denom, coefficients_num, coefficients_denom)

    assert out.shape == x.shape and out.dtype == x.dtype
    assert jnp.allclose(out, ref, atol=1e-5, rtol=1e-5)

    # TODO(synk): init_coeffs (offline Adam fitting + pickle cache) is
    # training-time setup, not part of the forward pass, and is not translated.

    print("KERNEL_OK")
</pallas_src>

<mosaic_0001>
module attributes {stable_mosaic.version = 11 : i64} {
  func.func @_tropical_kernel(%arg0: i32, %arg1: memref<4xf32, #tpu.memory_space<smem>>, %arg2: memref<4xf32, #tpu.memory_space<smem>>, %arg3: memref<4xf32, #tpu.memory_space<smem>>, %arg4: memref<4xf32, #tpu.memory_space<smem>>, %arg5: memref<1x2048xf32, #tpu.memory_space<vmem>>, %arg6: memref<1x2048xf32, #tpu.memory_space<vmem>>) attributes {dimension_semantics = [#tpu.dimension_semantics<parallel>], iteration_bounds = array<i64: 1>, scalar_prefetch = 0 : i64, scratch_operands = 0 : i64, tpu.core_type = #tpu.core_type<tc>, window_params = [{transform_indices = @transform_0, window_bounds = array<i64: 4>}, {transform_indices = @transform_1, window_bounds = array<i64: 4>}, {transform_indices = @transform_2, window_bounds = array<i64: 4>}, {transform_indices = @transform_3, window_bounds = array<i64: 4>}, {transform_indices = @transform_4, window_bounds = array<i64: 1, 2048>}, {transform_indices = @transform_5, window_bounds = array<i64: 1, 2048>}]} {
    %c0 = arith.constant 0 : index
    %c0_0 = arith.constant 0 : index
    %0 = vector.load %arg5[%c0, %c0_0] : memref<1x2048xf32, #tpu.memory_space<vmem>>, vector<1x2048xf32>
    %c0_1 = arith.constant 0 : index
    %1 = memref.load %arg1[%c0_1] : memref<4xf32, #tpu.memory_space<smem>>
    %c1 = arith.constant 1 : index
    %2 = memref.load %arg1[%c1] : memref<4xf32, #tpu.memory_space<smem>>
    %c2 = arith.constant 2 : index
    %3 = memref.load %arg1[%c2] : memref<4xf32, #tpu.memory_space<smem>>
    %c3 = arith.constant 3 : index
    %4 = memref.load %arg1[%c3] : memref<4xf32, #tpu.memory_space<smem>>
    %c0_2 = arith.constant 0 : index
    %5 = memref.load %arg2[%c0_2] : memref<4xf32, #tpu.memory_space<smem>>
    %c1_3 = arith.constant 1 : index
    %6 = memref.load %arg2[%c1_3] : memref<4xf32, #tpu.memory_space<smem>>
    %c2_4 = arith.constant 2 : index
    %7 = memref.load %arg2[%c2_4] : memref<4xf32, #tpu.memory_space<smem>>
    %c3_5 = arith.constant 3 : index
    %8 = memref.load %arg2[%c3_5] : memref<4xf32, #tpu.memory_space<smem>>
    %c0_6 = arith.constant 0 : index
    %9 = memref.load %arg3[%c0_6] : memref<4xf32, #tpu.memory_space<smem>>
    %c1_7 = arith.constant 1 : index
    %10 = memref.load %arg3[%c1_7] : memref<4xf32, #tpu.memory_space<smem>>
    %c2_8 = arith.constant 2 : index
    %11 = memref.load %arg3[%c2_8] : memref<4xf32, #tpu.memory_space<smem>>
    %c3_9 = arith.constant 3 : index
    %12 = memref.load %arg3[%c3_9] : memref<4xf32, #tpu.memory_space<smem>>
    %c0_10 = arith.constant 0 : index
    %13 = memref.load %arg4[%c0_10] : memref<4xf32, #tpu.memory_space<smem>>
    %c1_11 = arith.constant 1 : index
    %14 = memref.load %arg4[%c1_11] : memref<4xf32, #tpu.memory_space<smem>>
    %c2_12 = arith.constant 2 : index
    %15 = memref.load %arg4[%c2_12] : memref<4xf32, #tpu.memory_space<smem>>
    %c3_13 = arith.constant 3 : index
    %16 = memref.load %arg4[%c3_13] : memref<4xf32, #tpu.memory_space<smem>>
    %17 = vector.broadcast %1 : f32 to vector<1x2048xf32>
    %18 = arith.mulf %0, %17 : vector<1x2048xf32>
    %19 = vector.broadcast %9 : f32 to vector<1x2048xf32>
    %20 = arith.addf %18, %19 : vector<1x2048xf32>
    %21 = vector.broadcast %5 : f32 to vector<1x2048xf32>
    %22 = arith.mulf %0, %21 : vector<1x2048xf32>
    %23 = vector.broadcast %13 : f32 to vector<1x2048xf32>
    %24 = arith.addf %22, %23 : vector<1x2048xf32>
    %25 = vector.broadcast %2 : f32 to vector<1x2048xf32>
    %26 = arith.mulf %0, %25 : vector<1x2048xf32>
    %27 = vector.broadcast %10 : f32 to vector<1x2048xf32>
    %28 = arith.addf %26, %27 : vector<1x2048xf32>
    %29 = arith.maximumf %20, %28 : vector<1x2048xf32>
    %30 = vector.broadcast %6 : f32 to vector<1x2048xf32>
    %31 = arith.mulf %0, %30 : vector<1x2048xf32>
    %32 = vector.broadcast %14 : f32 to vector<1x2048xf32>
    %33 = arith.addf %31, %32 : vector<1x2048xf32>
    %34 = arith.maximumf %24, %33 : vector<1x2048xf32>
    %35 = vector.broadcast %3 : f32 to vector<1x2048xf32>
    %36 = arith.mulf %0, %35 : vector<1x2048xf32>
    %37 = vector.broadcast %11 : f32 to vector<1x2048xf32>
    %38 = arith.addf %36, %37 : vector<1x2048xf32>
    %39 = arith.maximumf %29, %38 : vector<1x2048xf32>
    %40 = vector.broadcast %7 : f32 to vector<1x2048xf32>
    %41 = arith.mulf %0, %40 : vector<1x2048xf32>
    %42 = vector.broadcast %15 : f32 to vector<1x2048xf32>
    %43 = arith.addf %41, %42 : vector<1x2048xf32>
    %44 = arith.maximumf %34, %43 : vector<1x2048xf32>
    %45 = vector.broadcast %4 : f32 to vector<1x2048xf32>
    %46 = arith.mulf %0, %45 : vector<1x2048xf32>
    %47 = vector.broadcast %12 : f32 to vector<1x2048xf32>
    %48 = arith.addf %46, %47 : vector<1x2048xf32>
    %49 = arith.maximumf %39, %48 : vector<1x2048xf32>
    %50 = vector.broadcast %8 : f32 to vector<1x2048xf32>
    %51 = arith.mulf %0, %50 : vector<1x2048xf32>
    %52 = vector.broadcast %16 : f32 to vector<1x2048xf32>
    %53 = arith.addf %51, %52 : vector<1x2048xf32>
    %54 = arith.maximumf %44, %53 : vector<1x2048xf32>
    %55 = arith.subf %49, %54 : vector<1x2048xf32>
    %c0_14 = arith.constant 0 : index
    %c0_15 = arith.constant 0 : index
    %56 = vector.load %arg6[%c0_14, %c0_15] : memref<1x2048xf32, #tpu.memory_space<vmem>>, vector<1x2048xf32>
    tpu.vector_store %arg6[%c0_14, %c0_15], %55 {strides = array<i32>} : memref<1x2048xf32, #tpu.memory_space<vmem>>, vector<1x2048xf32>,
    return
  }
  func.func @transform_0(%arg0: i32) -> i32 {
    %c0_i32 = arith.constant 0 : i32
    %c0_i32_0 = arith.constant 0 : i32
    return %c0_i32 : i32
  }
  func.func @transform_1(%arg0: i32) -> i32 {
    %c0_i32 = arith.constant 0 : i32
    %c0_i32_0 = arith.constant 0 : i32
    return %c0_i32 : i32
  }
  func.func @transform_2(%arg0: i32) -> i32 {
    %c0_i32 = arith.constant 0 : i32
    %c0_i32_0 = arith.constant 0 : i32
    return %c0_i32 : i32
  }
  func.func @transform_3(%arg0: i32) -> i32 {
    %c0_i32 = arith.constant 0 : i32
    %c0_i32_0 = arith.constant 0 : i32
    return %c0_i32 : i32
  }
  func.func @transform_4(%arg0: i32) -> (i32, i32) {
    %c0_i32 = arith.constant 0 : i32
    %c0_i32_0 = arith.constant 0 : i32
    return %arg0, %c0_i32 : i32, i32
  }
  func.func @transform_5(%arg0: i32) -> (i32, i32) {
    %c0_i32 = arith.constant 0 : i32
    %c0_i32_0 = arith.constant 0 : i32
    return %arg0, %c0_i32 : i32, i32
  }
}

</mosaic_0001>

<bundles_post_ra>
// kernel: tpu_custom_call.1
= control target key start
LH: loop header
LB: loop body
LE: loop exit
PB: predicated region body
PF: predicated region fallthrough
CT: control target
= control target key end

     0   :  { %10 = vsyncpa [#allocation5], 0  ;;  %s400_s0 = inlined_call_operand.hbm [shape: f32[4], index: 0, kind: input, shape index: {}]   ;;  %s401_s1 = inlined_call_operand.hbm [shape: f32[4], index: 1, kind: input, shape index: {}]   ;;  %s402_s2 = inlined_call_operand.vmem [shape: f32[4], index: 2, kind: input, shape index: {}]   ;;  %s403_s3 = inlined_call_operand.vmem [shape: f32[4], index: 3, kind: input, shape index: {}]   ;;  %s404_s4 = inlined_call_operand.hbm [shape: f32[1,2048], index: 4, kind: input, shape index: {}]   ;;  %s405_s5 = inlined_call_operand.hbm [shape: f32[1,2048], index: 5, kind: output, shape index: {}]  }
   0x1   :  { %11 = vsyncpa [#allocation8], 0 }
   0x2   :  { %12 = vsyncpa [#allocation6], 0 }
   0x3   :  { %13 = vsyncpa [#allocation11], 0 }
   0x4   :  { %14 = vsyncpa [#allocation3], 0 }
   0x5   :  { %15 = vsyncpa [#allocation4], 0  ;;  %s21_s20 = sshll.u32 %s400_s0, 4  ;;  %s30_s23 = sshll.u32 %s401_s1, 4  ;;  %s22_s20 = int_to_ptr.hbm [resolvable:$true] %s21_s20  ;;  %s31_s23 = int_to_ptr.hbm [resolvable:$true] %s30_s23 }
   0x6   :  { %s313_s24 = smov [#allocation2]   ;;  %s314_s25 = smov [#allocation7]  }
   0x7   :  { %24 = dma.hbm_to_smem %s22_s20, 16, %s313_s24, [#allocation5]  }
   0x8   :  { %33 = dma.hbm_to_smem %s31_s23, 16, %s314_s25, [#allocation8]  }
   0x9   :  { %s39_s28 = sshll.u32 %s402_s2, 4  ;;  %s48_s6 = sshll.u32 %s403_s3, 4  ;;  %s40_s28 = int_to_ptr.vmem [resolvable:$true] %s39_s28  ;;  %s49_s6 = int_to_ptr.vmem [resolvable:$true] %s48_s6 }
   0xa   :  { %s315_s0 = smov [#allocation9]   ;;  %s316_s7 = smov [#allocation10]  }
   0xb   :  { %42 = dma.vmem_to_smem %s40_s28, 16, %s315_s0, [#allocation6]  }
   0xc   :  { %51 = dma.vmem_to_smem %s49_s6, 16, %s316_s7, [#allocation11]  }
   0xd   :  { %s57_s9 = sshll.u32 %s404_s4, 4  ;;  %s317_s10 = smov [#allocation12]   ;;  %s58_s9 = int_to_ptr.hbm [resolvable:$true] %s57_s9 }
   0xe   :  { %s59_s11 = sshll.u32 %s317_s10, 4  ;;  %s60_s11 = int_to_ptr.vmem [resolvable:$true] %s59_s11 }
   0xf   :  { %62 = dma.hbm_to_vmem [thread:$0]  %s58_s9, 256, %s60_s11, [#allocation3]  }
  0x10   :  { %301 = dma.done.wait [#allocation5], 16  }
  0x11   :  { %302 = vsyncadd [#allocation5], 4294967280 }
  0x12   :  { %303 = dma.done.wait [#allocation8], 16  }
  0x13   :  { %304 = vsyncadd [#allocation8], 4294967280 }
  0x14   :  { %305 = dma.done.wait [#allocation6], 16  }
  0x15   :  { %306 = vsyncadd [#allocation6], 4294967280 }
  0x16   :  { %307 = dma.done.wait [#allocation11], 16  }
  0x17   :  { %308 = vsyncadd [#allocation11], 4294967280 }
  0x18   :  { %309 = dma.done.wait [#allocation3], 256  }
  0x19   :  { %310 = vsyncadd [#allocation3], 4294967040 }
  0x1a   :  { %83 = sfence }
  0x1b   :  { %s86_s2 = sld [smem:[#allocation2]]  ;;  %v84_v0 = vld [vmem:[#allocation12] sm:$0xff]  ;;  %v85_v3 = vld [vmem:[#allocation12 + $0x8] sm:$0xff]  ;;  %s318_s25 = smov [#allocation13]  }
  0x1c   :  { %s187_s3 = sld [smem:[#allocation2 + $0x1]]  ;;  %s171_s26 = sshll.u32 %s318_s25, 4  ;;  %s172_s26 = int_to_ptr.vmem [resolvable:$true] %s171_s26 }
  0x1d   :  { %s188_s12 = sld [smem:[#allocation2 + $0x2]]  ;;  %s173_s29 = sshll.u32 %s405_s5, 4  ;;  %s174_s29 = int_to_ptr.hbm [resolvable:$true] %s173_s29 }
  0x1e   :  { %s189_s4 = sld [smem:[#allocation2 + $0x3]] }
  0x1f   :  { %s90_s13 = sld [smem:[#allocation7]] }
  0x20   :  { %s364_s14 = sld [smem:[#allocation7 + $0x1]] }
  0x21   :  { %s366_s15 = sld [smem:[#allocation7 + $0x2]]  ;;  %v102_v1 = vstv %s86_s2 }
  0x22   :  { %s368_s16 = sld [smem:[#allocation7 + $0x3]]  ;;  %v114_v2 = vstv %s187_s3  ;;  %v103_v6 = vmul.f32 %v102_v1, %v84_v0  ;;  %v104_v10 = vmul.f32 %v102_v1, %v85_v3 }
  0x23   :  { %s370_s17 = sld [smem:[#allocation9]]  ;;  %v130_v4 = vstv %s188_s12  ;;  %v115_v8 = vmul.f32 %v114_v2, %v84_v0  ;;  %v116_v11 = vmul.f32 %v114_v2, %v85_v3 }
  0x24   :  { %s372_s18 = sld [smem:[#allocation9 + $0x1]]  ;;  %v146_v5 = vstv %s189_s4  ;;  %v131_v12 = vmul.f32 %v130_v4, %v84_v0  ;;  %v132_v15 = vmul.f32 %v130_v4, %v85_v3 }
  0x25   :  { %s374_s19 = sld [smem:[#allocation9 + $0x2]]  ;;  %v108_v7 = vstv %s90_s13  ;;  %v147_v14 = vmul.f32 %v146_v5, %v84_v0  ;;  %v148_v19 = vmul.f32 %v146_v5, %v85_v3 }
  0x26   :  { %s376_s20 = sld [smem:[#allocation9 + $0x3]]  ;;  %v122_v9 = vstv %s364_s14  ;;  %v109_v16 = vmul.f32 %v108_v7, %v84_v0  ;;  %v110_v18 = vmul.f32 %v108_v7, %v85_v3 }
  0x27   :  { %s379_s21 = sld [smem:[#allocation10]]  ;;  %v138_v13 = vstv %s366_s15  ;;  %v123_v21 = vmul.f32 %v122_v9, %v84_v0  ;;  %v124_v23 = vmul.f32 %v122_v9, %v85_v3 }
  0x28   :  { %s382_s22 = sld [smem:[#allocation10 + $0x1]]  ;;  %v154_v17 = vstv %s368_s16  ;;  %v139_v22 = vmul.f32 %v138_v13, %v84_v0  ;;  %v140_v27 = vmul.f32 %v138_v13, %v85_v3 }
  0x29   :  { %s385_s23 = sld [smem:[#allocation10 + $0x2]]  ;;  %v105_v20 = vstv %s370_s17  ;;  %v155_v30 = vmul.f32 %v154_v17, %v84_v0  ;;  %v156_v35 = vmul.f32 %v154_v17, %v85_v3 }
  0x2a   :  { %s388_s24 = sld [smem:[#allocation10 + $0x3]]  ;;  %v106_v24 = vadd.f32 %v105_v20, %v103_v6  ;;  %v117_v25 = vstv %s372_s18  ;;  %v107_v26 = vadd.f32 %v105_v20, %v104_v10 }
  0x2b   :  { %v118_v28 = vadd.f32 %v117_v25, %v115_v8  ;;  %v133_v29 = vstv %s374_s19  ;;  %v119_v31 = vadd.f32 %v117_v25, %v116_v11 }
  0x2c   :  { %v134_v32 = vadd.f32 %v133_v29, %v131_v12  ;;  %v149_v33 = vstv %s376_s20  ;;  %v135_v34 = vadd.f32 %v133_v29, %v132_v15 }
  0x2d   :  { %v111_v36 = vstv %s379_s21  ;;  %v120_v37 = vmax.f32 %v106_v24, %v118_v28  ;;  %v150_v38 = vadd.f32 %v149_v33, %v147_v14  ;;  %v121_v39 = vmax.f32 %v107_v26, %v119_v31 }
  0x2e   :  { %v112_v40 = vadd.f32 %v111_v36, %v109_v16  ;;  %v125_v41 = vstv %s382_s22  ;;  %v113_v42 = vadd.f32 %v111_v36, %v110_v18  ;;  %v151_v43 = vadd.f32 %v149_v33, %v148_v19 }
  0x2f   :  { %v126_v44 = vadd.f32 %v125_v41, %v123_v21  ;;  %v136_v45 = vmax.f32 %v120_v37, %v134_v32  ;;  %v141_v46 = vstv %s385_s23  ;;  %v127_v47 = vadd.f32 %v125_v41, %v124_v23 }
  0x30   :  { %v142_v48 = vadd.f32 %v141_v46, %v139_v22  ;;  %v157_v49 = vstv %s388_s24  ;;  %v137_v50 = vmax.f32 %v121_v39, %v135_v34  ;;  %v143_v51 = vadd.f32 %v141_v46, %v140_v27 }
  0x31   :  { %v128_v52 = vmax.f32 %v112_v40, %v126_v44  ;;  %v158_v53 = vadd.f32 %v157_v49, %v155_v30  ;;  %v129_v54 = vmax.f32 %v113_v42, %v127_v47  ;;  %v159_v55 = vadd.f32 %v157_v49, %v156_v35 }
  0x32   :  { %v152_v57 = vmax.f32 %v136_v45, %v150_v38  ;;  %v153_v59 = vmax.f32 %v137_v50, %v151_v43 }
  0x33   :  { %v144_v56 = vmax.f32 %v128_v52, %v142_v48  ;;  %v145_v58 = vmax.f32 %v129_v54, %v143_v51 }
  0x35   :  { %v160_v60 = vmax.f32 %v144_v56, %v158_v53  ;;  %v161_v61 = vmax.f32 %v145_v58, %v159_v55 }
  0x37   :  { %v162_v62 = vsub.f32 %v152_v57, %v160_v60  ;;  %v163_v63 = vsub.f32 %v153_v59, %v161_v61 }
  0x39   :  { %164 = vst [vmem:[#allocation13] sm:$0xff] %v162_v62 }
  0x3a   :  { %165 = vst [vmem:[#allocation13 + $0x8] sm:$0xff] %v163_v63 }
  0x3b   :  { %176 = dma.vmem_to_hbm [thread:$0]  %s172_s26, 256, %s174_s29, [#allocation4]  }
  0x3c   :  { %311 = dma.done.wait [#allocation4], 256  }
  0x3d   :  { %312 = vsyncadd [#allocation4], 4294967040 }
  0x3e   :  { %181 = vsyncpa [#allocation3], 1 }
  0x3f   :  { %182 = vsyncpa [#allocation4], 1 }
  0x40   :  { %183 = vsyncpa [#allocation5], 1 }
  0x41   :  { %184 = vsyncpa [#allocation8], 1 }
  0x42   :  { %185 = vsyncpa [#allocation6], 1 }
  0x43   :  { %186 = vsyncpa [#allocation11], 1 }

</bundles_post_ra>
